<compile_context>
chip_gen: v7x
topology: tpu7x:2x2x1
jax: 0.10.0
libtpu: 0.0.40
codegen_flags: <defaults>
</compile_context>

<pallas_src>
import math

import jax
import jax.numpy as jnp
from jax.experimental import pallas as pl
from jax.experimental.pallas import tpu as pltpu

OUT_LEN = 26   # hard-coded "26" in make_feature_dim = nn.Linear(L, 26)
OUT_PAD = 32   # pad 26 -> 32 sublanes (multiple of 8) for unmasked tiles


def _pre_encoder_kernel(x_ref, w_ref, b_ref, out_ref):
    # x_ref: (L, TB*D)  w_ref: (OUT_PAD, L)  b_ref: (OUT_PAD, 1)  out_ref: (OUT_PAD, TB*D)
    y = jnp.dot(w_ref[...], x_ref[...], preferred_element_type=jnp.float32)
    out_ref[...] = (y + b_ref[...]).astype(out_ref.dtype)


def _pick_batch_tile(B, L, D, budget_bytes=8 << 20):
    """Largest batch-chunk TB s.t. the block fits the VMEM budget, B % TB == 0,
    and TB*D is a multiple of 128 (lane-dense tiles) whenever TB < B."""
    per_b = (L * D + OUT_PAD * D) * 4
    tb = max(1, min(B, budget_bytes // max(per_b, 1)))
    while tb > 1 and (B % tb != 0 or (tb * D) % 128 != 0):
        tb -= 1
    if B % tb != 0 or (tb < B and (tb * D) % 128 != 0):
        tb = B  # fall back to a single block covering the whole batch
    return tb


def pre_encoder_forward(text, emb_table, w, bias):
    """text: int32 [B, L]; emb_table: [vocab, D]; w: [OUT_LEN, L]; bias: [OUT_LEN]."""
    B, L = text.shape
    D = emb_table.shape[1]
    scale = math.sqrt(D)

    # Embedding gather (XLA) + layout fold: (B, L, D) -> (L, B, D) -> (L, B*D).
    # D must stay contiguous within each batch group (transpose THEN reshape).
    emb = jnp.take(emb_table, text, axis=0)                     # [B, L, D]
    x = jnp.transpose(emb, (1, 0, 2)).reshape(L, B * D)         # [L, B*D]

    # Fold sqrt(D) into W; zero-pad rows 26..31 so the output tile is unmasked.
    w_pad = jnp.zeros((OUT_PAD, L), jnp.float32).at[:OUT_LEN].set(
        w.astype(jnp.float32) * scale)
    b_pad = jnp.zeros((OUT_PAD, 1), jnp.float32).at[:OUT_LEN, 0].set(
        bias.astype(jnp.float32))

    tb = _pick_batch_tile(B, L, D)
    n_blocks = B // tb

    cost = pl.CostEstimate(
        flops=2 * OUT_PAD * L * B * D,
        transcendentals=0,
        bytes_accessed=4 * (L * B * D + OUT_PAD * L + OUT_PAD + OUT_PAD * B * D),
    )

    out_flat = pl.pallas_call(
        _pre_encoder_kernel,
        out_shape=jax.ShapeDtypeStruct((OUT_PAD, B * D), jnp.float32),
        grid_spec=pltpu.PrefetchScalarGridSpec(
            num_scalar_prefetch=0,
            grid=(n_blocks,),
            in_specs=[
                pl.BlockSpec((L, tb * D), lambda i: (0, i)),
                pl.BlockSpec((OUT_PAD, L), lambda i: (0, 0)),
                pl.BlockSpec((OUT_PAD, 1), lambda i: (0, 0)),
            ],
            out_specs=pl.BlockSpec((OUT_PAD, tb * D), lambda i: (0, i)),
        ),
        compiler_params=pltpu.CompilerParams(
            dimension_semantics=("parallel",),
        ),
        cost_estimate=cost,
    )(x, w_pad, b_pad)

    # (OUT_PAD, B*D) -> (B, OUT_PAD, D) -> slice padded rows off -> (B, 26, D)
    out = jnp.transpose(out_flat.reshape(OUT_PAD, B, D), (1, 0, 2))
    return out[:, :OUT_LEN, :]


def pre_encoder_reference(text, emb_table, w, bias):
    D = emb_table.shape[1]
    emb = jnp.take(emb_table, text, axis=0) * math.sqrt(D)      # [B, L, D]
    vf = jnp.transpose(emb, (0, 2, 1))                          # [B, D, L]
    vf = jnp.einsum("bdl,ol->bdo", vf, w) + bias                # [B, D, OUT_LEN]
    return jnp.transpose(vf, (0, 2, 1))                         # [B, OUT_LEN, D]


if __name__ == "__main__":
    # Small shapes consistent with the module:
    #   opt.hidden_size = 32 (d_model), opt.src_num_class = 16 (vocab),
    #   opt.src_batch_max_length + 1 = 8 (seq len), batch = 2.
    B, L, D, VOCAB = 2, 8, 32, 16

    key = jax.random.PRNGKey(0)
    k_tab, k_w, k_b, k_txt = jax.random.split(key, 4)

    emb_table = jax.random.normal(k_tab, (VOCAB, D), dtype=jnp.float32)   # nn.Embedding ~ N(0,1)
    lim = 1.0 / math.sqrt(L)
    w = jax.random.uniform(k_w, (OUT_LEN, L), minval=-lim, maxval=lim,
                           dtype=jnp.float32)                             # nn.Linear weight
    bias = jax.random.uniform(k_b, (OUT_LEN,), minval=-lim, maxval=lim,
                              dtype=jnp.float32)                          # nn.Linear bias
    text = jax.random.randint(k_txt, (B, L), 0, VOCAB, dtype=jnp.int32)

    out = pre_encoder_forward(text, emb_table, w, bias)
    out = jax.block_until_ready(out)

    ref = pre_encoder_reference(text, emb_table, w, bias)
    assert out.shape == (B, OUT_LEN, D)
    assert jnp.allclose(out, ref, atol=1e-4, rtol=1e-4)

    print("KERNEL_OK")
</pallas_src>

<mosaic_0001>
module attributes {stable_mosaic.version = 11 : i64} {
  func.func @_pre_encoder_kernel(%arg0: i32, %arg1: memref<8x64xf32, #tpu.memory_space<vmem>>, %arg2: memref<32x8xf32, #tpu.memory_space<vmem>>, %arg3: memref<32x1xf32, #tpu.memory_space<vmem>>, %arg4: memref<32x64xf32, #tpu.memory_space<vmem>>) attributes {dimension_semantics = [#tpu.dimension_semantics<parallel>], iteration_bounds = array<i64: 1>, scalar_prefetch = 0 : i64, scratch_operands = 0 : i64, tpu.core_type = #tpu.core_type<tc>, window_params = [{transform_indices = @transform_0, window_bounds = array<i64: 8, 64>}, {pipeline_mode = #tpu.pipeline_mode<synchronous>, transform_indices = @transform_1, window_bounds = array<i64: 32, 8>}, {pipeline_mode = #tpu.pipeline_mode<synchronous>, transform_indices = @transform_2, window_bounds = array<i64: 32, 1>}, {transform_indices = @transform_3, window_bounds = array<i64: 32, 64>}]} {
    %c0 = arith.constant 0 : index
    %c0_0 = arith.constant 0 : index
    %0 = vector.load %arg2[%c0, %c0_0] : memref<32x8xf32, #tpu.memory_space<vmem>>, vector<32x8xf32>
    %c0_1 = arith.constant 0 : index
    %c0_2 = arith.constant 0 : index
    %1 = vector.load %arg1[%c0_1, %c0_2] : memref<8x64xf32, #tpu.memory_space<vmem>>, vector<8x64xf32>
    %cst = arith.constant dense<0.000000e+00> : vector<32x64xf32>
    %2 = tpu.matmul %0, %1, %cst {dimension_numbers = #tpu.dot_dimension_numbers<[1], [0], [0], [1], [0, 0, 1, 1], [], []>} : vector<32x8xf32>, vector<8x64xf32>, vector<32x64xf32> -> vector<32x64xf32>
    %c0_3 = arith.constant 0 : index
    %c0_4 = arith.constant 0 : index
    %3 = vector.load %arg3[%c0_3, %c0_4] : memref<32x1xf32, #tpu.memory_space<vmem>>, vector<32x1xf32>
    %4 = vector.broadcast %3 : vector<32x1xf32> to vector<32x64xf32>
    %5 = arith.addf %2, %4 : vector<32x64xf32>
    %c0_5 = arith.constant 0 : index
    %c0_6 = arith.constant 0 : index
    %6 = vector.load %arg4[%c0_5, %c0_6] : memref<32x64xf32, #tpu.memory_space<vmem>>, vector<32x64xf32>
    tpu.vector_store %arg4[%c0_5, %c0_6], %5 {strides = array<i32>} : memref<32x64xf32, #tpu.memory_space<vmem>>, vector<32x64xf32>,
    return
  }
  func.func @transform_0(%arg0: i32) -> (i32, i32) {
    %c0_i32 = arith.constant 0 : i32
    %c0_i32_0 = arith.constant 0 : i32
    return %c0_i32, %arg0 : i32, i32
  }
  func.func @transform_1(%arg0: i32) -> (i32, i32) {
    %c0_i32 = arith.constant 0 : i32
    %c0_i32_0 = arith.constant 0 : i32
    %c0_i32_1 = arith.constant 0 : i32
    return %c0_i32, %c0_i32_0 : i32, i32
  }
  func.func @transform_2(%arg0: i32) -> (i32, i32) {
    %c0_i32 = arith.constant 0 : i32
    %c0_i32_0 = arith.constant 0 : i32
    %c0_i32_1 = arith.constant 0 : i32
    return %c0_i32, %c0_i32_0 : i32, i32
  }
  func.func @transform_3(%arg0: i32) -> (i32, i32) {
    %c0_i32 = arith.constant 0 : i32
    %c0_i32_0 = arith.constant 0 : i32
    return %c0_i32, %arg0 : i32, i32
  }
}

</mosaic_0001>

<bundles_post_ra>
// kernel: tpu_custom_call.1
= control target key start
LH: loop header
LB: loop body
LE: loop exit
PB: predicated region body
PF: predicated region fallthrough
CT: control target
= control target key end

     0   :  { %vm44_vm0 = vcmask 64512   ;;  %s275_s0 = inlined_call_operand.vmem [shape: f32[8,64], index: 0, kind: input, shape index: {}]   ;;  %s276_s1 = inlined_call_operand.vmem [shape: f32[32,8], index: 1, kind: input, shape index: {}]   ;;  %s277_s2 = inlined_call_operand.vmem [shape: f32[32,1], index: 2, kind: input, shape index: {}]   ;;  %s278_s3 = inlined_call_operand.hbm [shape: f32[32,64], index: 3, kind: output, shape index: {}]  }
   0x1   :  { %v19_v0 = vld [vmem:[%s275_s0] sm:$0xff]  ;;  %v17_v2 = vld [vmem:[%s276_s1 + $0x10] sm:$0xff]  ;;  %v16_v3 = vld [vmem:[%s276_s1 + $0x8] sm:$0xff] }
   0x2   :  { %v15_v1 = vld [vmem:[%s276_s1] sm:$0xff]  ;;  %172 = vmatprep.subr.mxu0 %v19_v0  ;;  %180 = vmatprep.subr.mxu1 %v19_v0  ;;  %v18_v4 = vld [vmem:[%s276_s1 + $0x18] sm:$0xff]  ;;  %v22_v5 = vld [vmem:[%s277_s2 + $0x10] sm:$0xff] }
   0x3   :  { %173 = vmatpush3.msra.mxu0 %v19_v0  ;;  %181 = vmatpush3.msra.mxu1 %v19_v0  ;;  %v20_v6 = vld [vmem:[%s277_s2] sm:$0xff] }
   0x4   :  { %174 = vmatprep.mubr.msk.f32.mxu0 %vm44_vm0, %v15_v1  ;;  %177 = vmatprep.mubr.msk.f32.mxu1 %vm44_vm0, %v17_v2 }
   0x5   :  { %8 = vsyncpa [#allocation3], 0  ;;  %175 = vmatmul.mubr.msk.f32.vlgmr.msra.gmra.mrb[0].mxu0 %vm44_vm0, %v16_v3  ;;  %178 = vmatmul.mubr.msk.f32.vlgmr.msra.gmra.mrb[0].mxu1 %vm44_vm0, %v18_v4  ;;  %v212_v7 = vmov 0   ;;  %v23_v8 = vld [vmem:[%s277_s2 + $0x18] sm:$0xff]  ;;  %v21_v9 = vld [vmem:[%s277_s2 + $0x8] sm:$0xff]  ;;  %s213_s28 = smov [#allocation2]  }
   0x6   :  { %187 = vset.pattern.permute.xlu1 %v212_v7  ;;  %186 = vset.pattern.permute.xlu0 %v212_v7  ;;  %s152_s29 = sshll.u32 %s213_s28, 4  ;;  %vm142_vm1 = vcmask 523264   ;;  %s153_s29 = int_to_ptr.vmem [resolvable:$true] %s152_s29 }
   0x7   :  { %36 = vperm.xlu1 %187, %v22_v5   ;;  %26 = vperm.xlu0 %186, %v20_v6   ;;  %s188_s2 = scalar_lea.vmem %s153_s29, 512  ;;  %p193_p1 = scmp.lt.s32.totalorder %s153_s29, %s153_s29 }
   0x8   :  { %p189_p0 = scmp.ne.s32.totalorder %s153_s29, %s188_s2  ;;  %p194_p2 = scmp.lt.s32.totalorder %s188_s2, %s188_s2 }
   0xa   :  { %p195_p3 = por %p194_p2, %p193_p1 }
   0xb   :  { %41 = vperm.xlu1 %187, %v23_v8   ;;  %31 = vperm.xlu0 %186, %v21_v9  }
   0xc   :  { %p196_p4 = pnand %p195_p3, %p189_p0 }
  0x86   :  { %v37_v10 = vpop.permute.xlu1 %36  ;;  %v27_v11 = vpop.permute.xlu0 %26 }
  0x8a   :  { %v42_v12 = vpop.permute.xlu1 %41  ;;  %v32_v13 = vpop.permute.xlu0 %31 }
  0xd8   :  { %v176_v14 = vpop.f32.mrb[0].mxu0  ;;  %v179_v15 = vpop.f32.mrb[0].mxu1 }
  0xd9   :  { %v129_v16 = vadd.f32 %v176_v14, %v32_v13  ;;  %v139_v17 = vadd.f32 %v179_v15, %v42_v12  ;;  %v123_v18 = vpop.f32.mrb[1].mxu0  ;;  %v133_v19 = vpop.f32.mrb[1].mxu1 }
  0xda   :  { %v124_v20 = vadd.f32 %v123_v18, %v27_v11  ;;  %v134_v21 = vadd.f32 %v133_v19, %v37_v10 }
  0xdb   :  { %144 = vst.msk [vmem:[#allocation2 + $0x8] sm:$0xff] %vm142_vm1, %v129_v16  ;;  %146 = vst.msk [vmem:[#allocation2 + $0x18] sm:$0xff] %vm142_vm1, %v139_v17 }
  0xdc   :  { %143 = vst.msk [vmem:[#allocation2] sm:$0xff] %vm142_vm1, %v124_v20  ;;  %145 = vst.msk [vmem:[#allocation2 + $0x10] sm:$0xff] %vm142_vm1, %v134_v21 }
  0xdd   :  { %199 = shalt.err (!%p196_p4)
}
  0xde   :  { %s200_s5 = scalar_lea.hbm %s278_s3, 512 }
  0xdf   :  { %p201_p5 = scmp.ne.s32.totalorder %s278_s3, %s200_s5  ;;  %p204_p6 = scmp.lt.u32.totalorder %s200_s5, %s278_s3 }
  0xe1   :  { %p206_p7 = pnand %p204_p6, %p201_p5 }
  0xe3   :  { %209 = shalt.err (!%p206_p7)
}
  0xe4   :  { %s214_s10 = smov 128   ;;  %s215_s11 = smov 8  }
  0xe5   :  { %158 = dma.vmem_to_hbm [thread:$0]  %s153_s29, 512, %s278_s3, [#allocation3], %s214_s10, %s214_s10, %s215_s11  }
  0xe6   :  { %210 = dma.done.wait [#allocation3], 512  }
  0xe7   :  { %211 = vsyncadd [#allocation3], 4294966784 }
  0xe8   :  { %162 = vsyncpa [#allocation3], 1 }

</bundles_post_ra>
